<compile_context>
chip_gen: v5e
topology: v5e:2x2
jax: 0.10.0
libtpu: 0.0.40
codegen_flags: <defaults>
</compile_context>

<pallas_src>
import functools

import jax
import jax.numpy as jnp
from jax.experimental import pallas as pl
from jax.experimental.pallas import tpu as pltpu


def _wce_kernel(logits_ref, targets_ref, weights_ref, num_ref, den_ref, acc_ref,
                *, hw, tile_hw, tiles_per_core, first_masked_tile):
    """Weighted-CE partial sums for one (C, tile_hw) pixel tile.

    Grid = (core_split, N, tiles_per_core).  Pixels on lanes, classes on
    sublanes.

    logits_ref : (C, T)  VMEM tile (native dtype; cast to f32 in-register)
    targets_ref: (1, T)  i32 VMEM tile
    weights_ref: (C, 1)  f32 VMEM (class weights, resident across the grid)
    num_ref    : (1, 1)  f32 per-core weighted-loss partial (written at finalize)
    den_ref    : (1, 1)  f32 per-core weight-sum partial   (written at finalize)
    acc_ref    : (2, T)  f32 packed vector accumulator (row0=num, row1=den)
    """
    c = pl.program_id(0)   # core-split index
    n = pl.program_id(1)   # batch index
    jl = pl.program_id(2)  # per-core pixel-tile index

    @pl.when(jnp.logical_and(n == 0, jl == 0))
    def _init():
        acc_ref[...] = jnp.zeros_like(acc_ref)

    x = logits_ref[...].astype(jnp.float32)            # (C, T)
    t = targets_ref[...]                               # (1, T) int32
    w = weights_ref[...]                               # (C, 1) f32

    # Numerically stable log-sum-exp over classes (sublane axis).
    m = jnp.max(x, axis=0, keepdims=True)              # (1, T)
    lse = jnp.log(jnp.sum(jnp.exp(x - m), axis=0, keepdims=True)) + m

    # Select-based gather of the target logit and per-pixel class weight.
    # TODO(synk): torch's default ignore_index=-100 is not replicated; any
    # out-of-range target contributes zero to both numerator and denominator.
    cls_iota = jax.lax.broadcasted_iota(jnp.int32, x.shape, 0)        # (C, T)
    eq = cls_iota == t                                                # (C, T) bool
    t_logit = jnp.sum(jnp.where(eq, x, 0.0), axis=0, keepdims=True)   # (1, T)
    w_t = jnp.sum(jnp.where(eq, w, 0.0), axis=0, keepdims=True)       # (1, T)

    # Packed contribution: row 0 = w_t*(lse - x_t), row 1 = w_t.
    contrib = jnp.concatenate([w_t * (lse - t_logit), w_t], axis=0)   # (2, T)

    global_j = c * tiles_per_core + jl   # unclamped global pixel-tile index

    @pl.when(global_j < first_masked_tile)
    def _accumulate_full():
        # Hot path: full tiles need no mask at all.
        acc_ref[...] += contrib

    @pl.when(global_j >= first_masked_tile)
    def _accumulate_masked():
        # Last (partial) tile or a phantom tile from the core split.
        lane = jax.lax.broadcasted_iota(jnp.int32, (1, tile_hw), 1)
        valid = (global_j * tile_hw + lane) < hw                      # (1, T)
        # Keep this a select, not a multiply: tail lanes may hold NaN/Inf.
        acc_ref[...] += jnp.where(valid, contrib, 0.0)

    @pl.when(jnp.logical_and(n == pl.num_programs(1) - 1,
                             jl == pl.num_programs(2) - 1))
    def _finalize():
        acc = acc_ref[...]
        num_ref[...] = jnp.sum(acc[0:1, :], axis=1, keepdims=True)    # (1, 1)
        den_ref[...] = jnp.sum(acc[1:2, :], axis=1, keepdims=True)    # (1, 1)


def _vmem_limits():
    """Per-generation VMEM limit + tile budget (v7x has 64 MiB, v5e/v6e 128 MiB)."""
    cap = 64 * 1024 * 1024
    try:
        info = pltpu.get_tpu_info()
        cap = int(getattr(info, "vmem_capacity_bytes", cap))
    except Exception:
        pass
    vmem_limit = min((cap * 3) // 4, 96 * 1024 * 1024)   # 48 MiB v7x, 96 MiB v5e/v6e
    tile_budget = min(cap // 2, 72 * 1024 * 1024)        # 32 MiB v7x, 64 MiB v5e/v6e
    return vmem_limit, tile_budget


def _sublane_pad(rows, itemsize):
    """Rows after TPU sublane padding: multiples of 8 (f32), 16 (bf16), 32 (int8)."""
    mult = 8 * max(1, 4 // int(itemsize))
    return -(-rows // mult) * mult


def _choose_tile(hw, c, itemsize, requested, budget):
    """Largest lane-dense tile (multiple of 128) fitting a padding-aware VMEM budget."""
    tile = max(128, (int(requested) // 128) * 128)

    def footprint(t):
        logits_b = 2 * _sublane_pad(c, itemsize) * t * itemsize   # double-buffered input
        targets_b = 2 * _sublane_pad(1, 4) * t * 4                # double-buffered i32
        acc_b = _sublane_pad(2, 4) * t * 4                        # packed accumulator
        return logits_b + targets_b + acc_b

    while tile > 128 and footprint(tile) > budget:
        tile //= 2
    if hw <= tile:
        return hw  # full-extent block along the pixel axis (always layout-legal)
    return tile


@functools.partial(jax.jit, static_argnames=("tile_hw",))
def weighted_cross_entropy_loss(logits_nchw, targets_nhw, class_weights, tile_hw=65536):
    """logits_nchw: (N, C, H, W) float; targets_nhw: (N, H, W) int; class_weights: (C,)."""
    N, C, H, W = logits_nchw.shape
    HW = H * W

    vmem_limit, tile_budget = _vmem_limits()
    itemsize = jnp.dtype(logits_nchw.dtype).itemsize
    tile = _choose_tile(HW, C, itemsize, tile_hw, tile_budget)

    # Pure reshapes only (no transpose / pad / upcast).
    logits_flat = logits_nchw.reshape(N, C, HW)
    targets_flat = targets_nhw.reshape(N, 1, HW).astype(jnp.int32)
    weights_c1 = class_weights.reshape(C, 1).astype(jnp.float32)

    num_tiles = -(-HW // tile)
    ncores = 2 if num_tiles >= 2 else 1           # 2-way TC split of the pixel axis
    tiles_per_core = -(-num_tiles // ncores)
    has_phantom = ncores * tiles_per_core > num_tiles
    first_masked_tile = HW // tile                # first tile needing lane masking

    def pix_block(ci, ji):
        j = ci * tiles_per_core + ji
        # Phantom tiles (past the end) re-read the last real tile; the kernel
        # masks their contribution to zero.
        return jnp.minimum(j, num_tiles - 1) if has_phantom else j

    kernel = functools.partial(
        _wce_kernel, hw=HW, tile_hw=tile,
        tiles_per_core=tiles_per_core, first_masked_tile=first_masked_tile)

    num_parts, den_parts = pl.pallas_call(
        kernel,
        out_shape=(jax.ShapeDtypeStruct((ncores, 1, 1), jnp.float32),
                   jax.ShapeDtypeStruct((ncores, 1, 1), jnp.float32)),
        grid_spec=pltpu.PrefetchScalarGridSpec(
            num_scalar_prefetch=0,
            grid=(ncores, N, tiles_per_core),
            in_specs=[
                pl.BlockSpec((None, C, tile),
                             lambda ci, ni, ji: (ni, 0, pix_block(ci, ji))),
                pl.BlockSpec((None, 1, tile),
                             lambda ci, ni, ji: (ni, 0, pix_block(ci, ji))),
                pl.BlockSpec((C, 1), lambda ci, ni, ji: (0, 0)),   # resident weights
            ],
            out_specs=[
                pl.BlockSpec((None, 1, 1), lambda ci, ni, ji: (ci, 0, 0)),
                pl.BlockSpec((None, 1, 1), lambda ci, ni, ji: (ci, 0, 0)),
            ],
            scratch_shapes=[
                pltpu.VMEM((2, tile), jnp.float32),   # packed (num, den) accumulator
            ],
        ),
        compiler_params=pltpu.CompilerParams(
            # Leading core-split axis is independent (own accumulator + own output
            # rows) -> "parallel" so v7x can shard it across its 2 TensorCores.
            # Batch and pixel-tile axes feed the resident accumulator -> serial.
            dimension_semantics=("parallel", "arbitrary", "arbitrary"),
            vmem_limit_bytes=int(vmem_limit),
        ),
    )(logits_flat, targets_flat, weights_c1)

    return jnp.sum(num_parts) / jnp.sum(den_parts)


def _reference(logits_nchw, targets_nhw, class_weights):
    """Pure-JAX reference mirroring torch CrossEntropyLoss(weight=w, reduction='mean')."""
    N, C, H, W = logits_nchw.shape
    x = jnp.transpose(logits_nchw, (0, 2, 3, 1)).reshape(-1, C).astype(jnp.float32)
    t = targets_nhw.reshape(-1).astype(jnp.int32)
    logp = jax.nn.log_softmax(x, axis=-1)
    nll = -jnp.take_along_axis(logp, t[:, None], axis=-1)[:, 0]
    wt = class_weights[t]
    return jnp.sum(wt * nll) / jnp.sum(wt)


if __name__ == "__main__":
    # Module init: class_weights dict -> sorted weight vector (deterministic).
    class_weights_dict = {0: 1.0, 1: 2.0, 2: 0.5, 3: 1.5}
    sorted_keys = sorted(class_weights_dict.keys())
    weights = jnp.array([class_weights_dict[k] for k in sorted_keys], dtype=jnp.float32)

    key = jax.random.PRNGKey(0)
    k_l1, k_t1, k_l2, k_t2, k_l3, k_t3 = jax.random.split(key, 6)

    # Test 1: N=2, C=4, H=W=16 (single full tile, no masking, no core split).
    N, C, H, W = 2, 4, 16, 16
    logits = jax.random.normal(k_l1, (N, C, H, W), dtype=jnp.float32)
    targets = jax.random.randint(k_t1, (N, H, W), 0, C, dtype=jnp.int32)
    loss = jax.block_until_ready(weighted_cross_entropy_loss(logits, targets, weights))
    ref = _reference(logits, targets, weights)
    assert jnp.allclose(loss, ref, rtol=1e-5, atol=1e-5), (loss, ref)

    # Test 1b: bf16 logits (native-dtype HBM stream, f32 math in-register).
    logits_bf16 = logits.astype(jnp.bfloat16)
    loss_b = jax.block_until_ready(weighted_cross_entropy_loss(logits_bf16, targets, weights))
    ref_b = _reference(logits_bf16, targets, weights)
    assert jnp.allclose(loss_b, ref_b, rtol=1e-4, atol=1e-4), (loss_b, ref_b)

    # Test 2: non-tile-aligned HW=200 with tile=128 -> exercises the masked tail
    # tile and the 2-way core split (core 0: full tile, core 1: partial tile).
    weights3 = jnp.array([1.0, 0.7, 2.3], dtype=jnp.float32)
    N2, C2, H2, W2 = 1, 3, 10, 20
    logits2 = jax.random.normal(k_l2, (N2, C2, H2, W2), dtype=jnp.float32)
    targets2 = jax.random.randint(k_t2, (N2, H2, W2), 0, C2, dtype=jnp.int32)
    loss2 = jax.block_until_ready(
        weighted_cross_entropy_loss(logits2, targets2, weights3, tile_hw=128))
    ref2 = _reference(logits2, targets2, weights3)
    assert jnp.allclose(loss2, ref2, rtol=1e-5, atol=1e-5), (loss2, ref2)

    # Test 3: HW=384, tile=128 -> 3 tiles over 2 core splits (one phantom tile),
    # exercising the clamped index map + all-invalid mask path.
    weights5 = jnp.array([1.0, 0.5, 2.0, 1.3, 0.8], dtype=jnp.float32)
    N3, C3, H3, W3 = 1, 5, 12, 32
    logits3 = jax.random.normal(k_l3, (N3, C3, H3, W3), dtype=jnp.float32)
    targets3 = jax.random.randint(k_t3, (N3, H3, W3), 0, C3, dtype=jnp.int32)
    loss3 = jax.block_until_ready(
        weighted_cross_entropy_loss(logits3, targets3, weights5, tile_hw=128))
    ref3 = _reference(logits3, targets3, weights5)
    assert jnp.allclose(loss3, ref3, rtol=1e-5, atol=1e-5), (loss3, ref3)

    print("KERNEL_OK")
</pallas_src>

<mosaic_0001>
module attributes {stable_mosaic.version = 11 : i64} {
  func.func @_wce_kernel(%arg0: i32, %arg1: i32, %arg2: i32, %arg3: memref<1x4x256xf32, #tpu.memory_space<vmem>>, %arg4: memref<1x1x256xi32, #tpu.memory_space<vmem>>, %arg5: memref<4x1xf32, #tpu.memory_space<vmem>>, %arg6: memref<1x1x1xf32, #tpu.memory_space<vmem>>, %arg7: memref<1x1x1xf32, #tpu.memory_space<vmem>>, %arg8: memref<2x256xf32, #tpu.memory_space<vmem>>) attributes {dimension_semantics = [#tpu.dimension_semantics<parallel>, #tpu.dimension_semantics<arbitrary>, #tpu.dimension_semantics<arbitrary>], iteration_bounds = array<i64: 1, 2, 1>, scalar_prefetch = 0 : i64, scratch_operands = 1 : i64, tpu.core_type = #tpu.core_type<tc>, window_params = [{transform_indices = @transform_0, window_bounds = array<i64: 1, 4, 256>}, {transform_indices = @transform_1, window_bounds = array<i64: 1, 1, 256>}, {pipeline_mode = #tpu.pipeline_mode<synchronous>, transform_indices = @transform_2, window_bounds = array<i64: 4, 1>}, {transform_indices = @transform_3, window_bounds = array<i64: 1, 1, 1>}, {transform_indices = @transform_4, window_bounds = array<i64: 1, 1, 1>}]} {
    %c0_i32 = arith.constant 0 : i32
    %0 = arith.cmpi eq, %arg1, %c0_i32 : i32
    %c0_i32_0 = arith.constant 0 : i32
    %1 = arith.cmpi eq, %arg2, %c0_i32_0 : i32
    %2 = arith.andi %0, %1 : i1
    %3 = arith.extui %2 : i1 to i32
    %c0_i32_1 = arith.constant 0 : i32
    %4 = arith.cmpi ne, %3, %c0_i32_1 : i32
    scf.if %4 {
      %cst_21 = arith.constant 0.000000e+00 : f32
      %48 = vector.broadcast %cst_21 : f32 to vector<2x256xf32>
      %c0_22 = arith.constant 0 : index
      %c0_23 = arith.constant 0 : index
      %49 = vector.load %arg8[%c0_22, %c0_23] : memref<2x256xf32, #tpu.memory_space<vmem>>, vector<2x256xf32>
      tpu.vector_store %arg8[%c0_22, %c0_23], %48 {strides = array<i32>} : memref<2x256xf32, #tpu.memory_space<vmem>>, vector<2x256xf32>,
    } else {
    }
    %c0 = arith.constant 0 : index
    %c0_2 = arith.constant 0 : index
    %c0_3 = arith.constant 0 : index
    %5 = vector.load %arg3[%c0, %c0_2, %c0_3] : memref<1x4x256xf32, #tpu.memory_space<vmem>>, vector<1x4x256xf32>
    %6 = vector.shape_cast %5 : vector<1x4x256xf32> to vector<4x256xf32>
    %c0_4 = arith.constant 0 : index
    %c0_5 = arith.constant 0 : index
    %c0_6 = arith.constant 0 : index
    %7 = vector.load %arg4[%c0_4, %c0_5, %c0_6] : memref<1x1x256xi32, #tpu.memory_space<vmem>>, vector<1x1x256xi32>
    %8 = vector.shape_cast %7 : vector<1x1x256xi32> to vector<1x256xi32>
    %c0_7 = arith.constant 0 : index
    %c0_8 = arith.constant 0 : index
    %9 = vector.load %arg5[%c0_7, %c0_8] : memref<4x1xf32, #tpu.memory_space<vmem>>, vector<4x1xf32>
    %cst = arith.constant dense<0xFF800000> : vector<256xf32>
    %10 = vector.multi_reduction <maximumf>, %6, %cst [0] : vector<4x256xf32> to vector<256xf32>
    %11 = vector.shape_cast %10 : vector<256xf32> to vector<1x256xf32>
    %12 = vector.broadcast %11 : vector<1x256xf32> to vector<4x256xf32>
    %13 = arith.subf %6, %12 : vector<4x256xf32>
    %14 = math.exp %13 : vector<4x256xf32>
    %cst_9 = arith.constant dense<0.000000e+00> : vector<256xf32>
    %15 = vector.multi_reduction <add>, %14, %cst_9 [0] : vector<4x256xf32> to vector<256xf32>
    %16 = vector.shape_cast %15 : vector<256xf32> to vector<1x256xf32>
    %17 = math.log %16 : vector<1x256xf32>
    %18 = arith.addf %17, %11 : vector<1x256xf32>
    %19 = tpu.iota {dimensions = array<i32: 0>} : vector<4x256xi32>
    %20 = vector.broadcast %8 : vector<1x256xi32> to vector<4x256xi32>
    %21 = arith.cmpi eq, %19, %20 : vector<4x256xi32>
    %cst_10 = arith.constant 0.000000e+00 : f32
    %22 = vector.broadcast %cst_10 : f32 to vector<4x256xf32>
    %23 = arith.select %21, %6, %22 : vector<4x256xi1>, vector<4x256xf32>
    %cst_11 = arith.constant dense<0.000000e+00> : vector<256xf32>
    %24 = vector.multi_reduction <add>, %23, %cst_11 [0] : vector<4x256xf32> to vector<256xf32>
    %25 = vector.shape_cast %24 : vector<256xf32> to vector<1x256xf32>
    %cst_12 = arith.constant 0.000000e+00 : f32
    %26 = vector.shape_cast %9 : vector<4x1xf32> to vector<4x1xf32>
    %27 = vector.broadcast %26 : vector<4x1xf32> to vector<4x256xf32>
    %28 = vector.broadcast %cst_12 : f32 to vector<4x256xf32>
    %29 = arith.select %21, %27, %28 : vector<4x256xi1>, vector<4x256xf32>
    %cst_13 = arith.constant dense<0.000000e+00> : vector<256xf32>
    %30 = vector.multi_reduction <add>, %29, %cst_13 [0] : vector<4x256xf32> to vector<256xf32>
    %31 = vector.shape_cast %30 : vector<256xf32> to vector<1x256xf32>
    %32 = arith.subf %18, %25 : vector<1x256xf32>
    %33 = arith.mulf %31, %32 : vector<1x256xf32>
    %34 = tpu.concatenate %33, %31 in 0 : vector<1x256xf32>, vector<1x256xf32> -> vector<2x256xf32>
    %c1_i32 = arith.constant 1 : i32
    %35 = arith.muli %arg0, %c1_i32 : i32
    %36 = arith.addi %35, %arg2 : i32
    %c1_i32_14 = arith.constant 1 : i32
    %37 = arith.cmpi slt, %36, %c1_i32_14 : i32
    %38 = arith.extui %37 : i1 to i32
    %c0_i32_15 = arith.constant 0 : i32
    %39 = arith.cmpi ne, %38, %c0_i32_15 : i32
    scf.if %39 {
      %c0_21 = arith.constant 0 : index
      %c0_22 = arith.constant 0 : index
      %48 = vector.load %arg8[%c0_21, %c0_22] : memref<2x256xf32, #tpu.memory_space<vmem>>, vector<2x256xf32>
      %49 = arith.addf %48, %34 : vector<2x256xf32>
      %c0_23 = arith.constant 0 : index
      %c0_24 = arith.constant 0 : index
      %50 = vector.load %arg8[%c0_23, %c0_24] : memref<2x256xf32, #tpu.memory_space<vmem>>, vector<2x256xf32>
      tpu.vector_store %arg8[%c0_23, %c0_24], %49 {strides = array<i32>} : memref<2x256xf32, #tpu.memory_space<vmem>>, vector<2x256xf32>,
    } else {
    }
    %c1_i32_16 = arith.constant 1 : i32
    %40 = arith.cmpi sge, %36, %c1_i32_16 : i32
    %41 = arith.extui %40 : i1 to i32
    %c0_i32_17 = arith.constant 0 : i32
    %42 = arith.cmpi ne, %41, %c0_i32_17 : i32
    scf.if %42 {
      %48 = tpu.iota {dimensions = array<i32: 1>} : vector<1x256xi32>
      %c256_i32 = arith.constant 256 : i32
      %49 = arith.muli %36, %c256_i32 : i32
      %50 = vector.broadcast %49 : i32 to vector<1x256xi32>
      %51 = arith.addi %50, %48 : vector<1x256xi32>
      %c256_i32_21 = arith.constant 256 : i32
      %52 = vector.broadcast %c256_i32_21 : i32 to vector<1x256xi32>
      %53 = arith.cmpi slt, %51, %52 : vector<1x256xi32>
      %c0_22 = arith.constant 0 : index
      %c0_23 = arith.constant 0 : index
      %54 = vector.load %arg8[%c0_22, %c0_23] : memref<2x256xf32, #tpu.memory_space<vmem>>, vector<2x256xf32>
      %cst_24 = arith.constant 0.000000e+00 : f32
      %55 = vector.shape_cast %53 : vector<1x256xi1> to vector<1x256xi1>
      %56 = vector.broadcast %55 : vector<1x256xi1> to vector<2x256xi1>
      %57 = vector.broadcast %cst_24 : f32 to vector<2x256xf32>
      %58 = arith.select %56, %34, %57 : vector<2x256xi1>, vector<2x256xf32>
      %59 = arith.addf %54, %58 : vector<2x256xf32>
      %c0_25 = arith.constant 0 : index
      %c0_26 = arith.constant 0 : index
      %60 = vector.load %arg8[%c0_25, %c0_26] : memref<2x256xf32, #tpu.memory_space<vmem>>, vector<2x256xf32>
      tpu.vector_store %arg8[%c0_25, %c0_26], %59 {strides = array<i32>} : memref<2x256xf32, #tpu.memory_space<vmem>>, vector<2x256xf32>,
    } else {
    }
    %c1_i32_18 = arith.constant 1 : i32
    %43 = arith.cmpi eq, %arg1, %c1_i32_18 : i32
    %c0_i32_19 = arith.constant 0 : i32
    %44 = arith.cmpi eq, %arg2, %c0_i32_19 : i32
    %45 = arith.andi %43, %44 : i1
    %46 = arith.extui %45 : i1 to i32
    %c0_i32_20 = arith.constant 0 : i32
    %47 = arith.cmpi ne, %46, %c0_i32_20 : i32
    scf.if %47 {
      %c0_21 = arith.constant 0 : index
      %c0_22 = arith.constant 0 : index
      %48 = vector.load %arg8[%c0_21, %c0_22] : memref<2x256xf32, #tpu.memory_space<vmem>>, vector<2x256xf32>
      %49 = vector.extract_strided_slice %48 {offsets = [0, 0], sizes = [1, 256], strides = [1, 1]} : vector<2x256xf32> to vector<1x256xf32>
      %cst_23 = arith.constant dense<0.000000e+00> : vector<1xf32>
      %50 = vector.multi_reduction <add>, %49, %cst_23 [1] : vector<1x256xf32> to vector<1xf32>
      %51 = vector.shape_cast %50 : vector<1xf32> to vector<1x1xf32>
      %c0_24 = arith.constant 0 : index
      %c0_25 = arith.constant 0 : index
      %c0_26 = arith.constant 0 : index
      %52 = vector.load %arg6[%c0_24, %c0_25, %c0_26] : memref<1x1x1xf32, #tpu.memory_space<vmem>>, vector<1x1x1xf32>
      %53 = vector.shape_cast %52 : vector<1x1x1xf32> to vector<1x1xf32>
      %54 = vector.shape_cast %51 : vector<1x1xf32> to vector<1x1x1xf32>
      tpu.vector_store %arg6[%c0_24, %c0_25, %c0_26], %54 {strides = array<i32>} : memref<1x1x1xf32, #tpu.memory_space<vmem>>, vector<1x1x1xf32>,
      %55 = vector.extract_strided_slice %48 {offsets = [1, 0], sizes = [1, 256], strides = [1, 1]} : vector<2x256xf32> to vector<1x256xf32>
      %cst_27 = arith.constant dense<0.000000e+00> : vector<1xf32>
      %56 = vector.multi_reduction <add>, %55, %cst_27 [1] : vector<1x256xf32> to vector<1xf32>
      %57 = vector.shape_cast %56 : vector<1xf32> to vector<1x1xf32>
      %c0_28 = arith.constant 0 : index
      %c0_29 = arith.constant 0 : index
      %c0_30 = arith.constant 0 : index
      %58 = vector.load %arg7[%c0_28, %c0_29, %c0_30] : memref<1x1x1xf32, #tpu.memory_space<vmem>>, vector<1x1x1xf32>
      %59 = vector.shape_cast %58 : vector<1x1x1xf32> to vector<1x1xf32>
      %60 = vector.shape_cast %57 : vector<1x1xf32> to vector<1x1x1xf32>
      tpu.vector_store %arg7[%c0_28, %c0_29, %c0_30], %60 {strides = array<i32>} : memref<1x1x1xf32, #tpu.memory_space<vmem>>, vector<1x1x1xf32>,
    } else {
    }
    return
  }
  func.func @transform_0(%arg0: i32, %arg1: i32, %arg2: i32) -> (i32, i32, i32) {
    %c1_i32 = arith.constant 1 : i32
    %0 = arith.muli %arg0, %c1_i32 : i32
    %1 = arith.addi %0, %arg2 : i32
    %c0_i32 = arith.constant 0 : i32
    %c0_i32_0 = arith.constant 0 : i32
    return %arg1, %c0_i32, %1 : i32, i32, i32
  }
  func.func @transform_1(%arg0: i32, %arg1: i32, %arg2: i32) -> (i32, i32, i32) {
    %c1_i32 = arith.constant 1 : i32
    %0 = arith.muli %arg0, %c1_i32 : i32
    %1 = arith.addi %0, %arg2 : i32
    %c0_i32 = arith.constant 0 : i32
    %c0_i32_0 = arith.constant 0 : i32
    return %arg1, %c0_i32, %1 : i32, i32, i32
  }
  func.func @transform_2(%arg0: i32, %arg1: i32, %arg2: i32) -> (i32, i32) {
    %c0_i32 = arith.constant 0 : i32
    %c0_i32_0 = arith.constant 0 : i32
    %c0_i32_1 = arith.constant 0 : i32
    return %c0_i32, %c0_i32_0 : i32, i32
  }
  func.func @transform_3(%arg0: i32, %arg1: i32, %arg2: i32) -> (i32, i32, i32) {
    %c0_i32 = arith.constant 0 : i32
    %c0_i32_0 = arith.constant 0 : i32
    %c0_i32_1 = arith.constant 0 : i32
    return %arg0, %c0_i32, %c0_i32_0 : i32, i32, i32
  }
  func.func @transform_4(%arg0: i32, %arg1: i32, %arg2: i32) -> (i32, i32, i32) {
    %c0_i32 = arith.constant 0 : i32
    %c0_i32_0 = arith.constant 0 : i32
    %c0_i32_1 = arith.constant 0 : i32
    return %arg0, %c0_i32, %c0_i32_0 : i32, i32, i32
  }
}

</mosaic_0001>

<bundles_post_ra>
// kernel: weighted_cross_entropy_loss.1
= control target key start
LH: loop header
LB: loop body
LE: loop exit
PB: predicated region body
PF: predicated region fallthrough
CT: control target
= control target key end

     0   :  { %10 = vsyncpa [#allocation4], 0  ;;  %s867_s0 = inlined_call_operand.vmem [shape: f32[2,4,256], index: 0, kind: input, shape index: {}]   ;;  %s868_s1 = inlined_call_operand.vmem [shape: s32[2,1,256], index: 1, kind: input, shape index: {}]   ;;  %s869_s2 = inlined_call_operand.vmem [shape: f32[4,1], index: 2, kind: input, shape index: {}]   ;;  %s870_s3 = inlined_call_operand.hbm [shape: f32[1,1,1], index: 3, kind: output, shape index: {0}]   ;;  %s871_s4 = inlined_call_operand.hbm [shape: f32[1,1,1], index: 4, kind: output, shape index: {1}]  }
   0x1   :  { %11 = vsyncpa [#allocation6], 0  ;;  %s758_s15 = smov 0   ;;  %s760_s16 = smov 0  }
   0x2   :  { %s762_s17 = smov 0  }
   0x3 LB: > { %s576_s18 = sadd.s32 4294967295, %s727_s17   ;;  %s32_s19 = sadd.s32 1, %s723_s16  ;;  %s727_s17 = sphi %s762_s17, %s17_s17   ;;  %s723_s16 = sphi %s760_s16, %s878_s16   ;;  %s719_s15 = sphi %s758_s15, %s877_s15  }
   0x4   : > { %p34_p0 = scmp.ge.s32.totalorder %s32_s19, 2  ;;  %p579_p1 = scmp.ge.s32.totalorder %s727_s17, 1 }
   0x5   : > { %p217_p2 = scmp.lt.s32.totalorder %s727_s17, 3 }
   0x6   : > { %s880_s19 = smov (%p34_p0, %s32_s19), 0 }
   0x7   : > { %p218_p3 = pnand %p579_p1, %p217_p2 }
   0x8   : > { %p254_p4 = scmp.lt.s32.totalorder (!%p218_p3), %s719_s15, 1  ;;  %p275_p5 = scmp.eq.s32.totalorder (!%p218_p3), %s719_s15, 0 }
   0x9   : > { %221 = sbr.rel (%p218_p3) target bundleno = 307 (0x133), region = 32 }
   0xe   : > { %s255_s20 = scalar_select %p254_p4, %s719_s15, 1  ;;  %v729_v0 = vmov (%p275_p5), 0.0  }
   0xf   : > { %280 = sbr.rel (!%p275_p5) target bundleno = 20 (0x14), region = 36  ;;  %281 = vst [vmem:[#allocation2] sm:$0xf] (%p275_p5), %v729_v0 }
  0x10   : > { %s591_s21 = sshll.u32 %s255_s20, 3  ;;  %s582_s22 = sshll.u32 %s255_s20, 1 }
  0x11   : > { %s261_s25 = scalar_lea.vmem %s867_s0, %s591_s21  ;;  %s788_s28 = scalar_lea.vmem %s868_s1, %s582_s22 }
  0x14 PF: > { %v284_v1 = vld [vmem:[%s869_s2] sm:$0xf]  ;;  %v730_v2 = vmov 0   ;;  %p437_p6 = scmp.eq.s32.totalorder %s719_s15, 1  ;;  %vm291_vm0 = vcmask 1043456   ;;  %v340_v29 = vlaneseq  ;;  %vm392_vm3 = vcmask 1040384  }
  0x15   : > { %634 = vset.pattern.permute.xlu0 %v730_v2  ;;  %v282_v3 = vld [vmem:[%s261_s25] sm:$0xff]  ;;  %vm404_vm4 = vcmask 1041408   ;;  %vm459_vm5 = vcmask (%p437_p6), 1041409   ;;  %vm453_vm6 = vcmask (%p437_p6), 0   ;;  %vm465_vm7 = vcmask (%p437_p6), 1025  }
  0x16   : > { %369 = vperm.xlu0 %634, %v284_v1   ;;  %286 = vst [vmem:[#allocation1] ss:$2 sm:$0xff] %v282_v3  ;;  %v283_v31 = vld [vmem:[%s788_s28] sm:$0x3]  ;;  %v341_v33 = vshrl.u32 %v340_v29, 7 }
  0x17   : > { %v342_v35 = vperm.slane %v283_v31, 0  ;;  %v343_v37 = vperm.slane %v283_v31, 1  ;;  %v400_v31 = vld [vmem:[#allocation2] sm:$0xf] }
  0x19   : > { %vm806_vm1 = vcmp.eq.s32.totalorder %v341_v33, %v342_v35  ;;  %vm810_vm2 = vcmp.eq.s32.totalorder %v341_v33, %v343_v37 }
  0x1d   : > { %v288_v4 = vld.sshfl [vmem:[#allocation1 + $0x8] sm:$0xff pattern:$0x75316420]  ;;  %v287_v6 = vld.sshfl [vmem:[#allocation1] sm:$0xff pattern:$0x75316420] }
  0x1e   : > { %v299_v5 = vsel %vm291_vm0, %v288_v4, -inf  ;;  %v292_v8 = vsel %vm291_vm0, %v287_v6, -inf }
  0x1f   : > { %v300_v7 = vrot.slane %v299_v5, 4  ;;  %v293_v9 = vrot.slane %v292_v8, 4 }
  0x21   : > { %v301_v10 = vmax.f32 %v299_v5, %v300_v7  ;;  %v294_v11 = vmax.f32 %v292_v8, %v293_v9 }
  0x23   : > { %v302_v12 = vrot.slane %v301_v10, 2  ;;  %v295_v13 = vrot.slane %v294_v11, 2 }
  0x25   : > { %v303_v14 = vmax.f32 %v301_v10, %v302_v12  ;;  %v296_v15 = vmax.f32 %v294_v11, %v295_v13 }
  0x27   : > { %v304_v16 = vrot.slane %v303_v14, 1  ;;  %v297_v17 = vrot.slane %v296_v15, 1 }
  0x29   : > { %v796_v18 = vmax.f32 %v303_v14, %v304_v16  ;;  %v798_v19 = vmax.f32 %v296_v15, %v297_v17 }
  0x2b   : > { %v308_v20 = vrot.slane %v796_v18, 4 }
  0x2d   : > { %v309_v21 = vsel %vm291_vm0, %v798_v19, %v308_v20 }
  0x2e   : > { %v311_v22 = vsub.f32 %v282_v3, %v309_v21 }
  0x30   : > { %v312_v23 = vmul.f32 1.442695, %v311_v22 }
  0x32   : > { %635 = vpow2.f32 %v312_v23 }
  0x38   : > { %v636_v24 = vpop.eup %635 }
  0x39   : > { %315 = vst [vmem:[#allocation1] ss:$2 sm:$0xff] %v636_v24 }
  0x40   : > { %v316_v25 = vld.sshfl [vmem:[#allocation1] sm:$0xff pattern:$0x75316420]  ;;  %v317_v26 = vld.sshfl [vmem:[#allocation1 + $0x8] sm:$0xff pattern:$0x75316420] }
  0x41   : > { %346 = vst [vmem:[#allocation1] ss:$2 sm:$0xff] %v282_v3  ;;  %v320_v27 = vsel %vm291_vm0, %v316_v25, 0.0  ;;  %v327_v28 = vsel %vm291_vm0, %v317_v26, 0.0 }
  0x42   : > { %v321_v30 = vrot.slane %v320_v27, 4  ;;  %v328_v32 = vrot.slane %v327_v28, 4 }
  0x44   : > { %v322_v34 = vadd.f32 %v321_v30, %v320_v27  ;;  %v329_v36 = vadd.f32 %v328_v32, %v327_v28 }
  0x46   : > { %v323_v38 = vrot.slane %v322_v34, 2  ;;  %v330_v41 = vrot.slane %v329_v36, 2 }
  0x48   : > { %v347_v40 = vld.sshfl [vmem:[#allocation1] sm:$0xff pattern:$0x75316420]  ;;  %v348_v43 = vld.sshfl [vmem:[#allocation1 + $0x8] sm:$0xff pattern:$0x75316420]  ;;  %v324_v45 = vadd.f32 %v323_v38, %v322_v34  ;;  %v331_v47 = vadd.f32 %v330_v41, %v329_v36 }
  0x49   : > { %v351_v44 = vsel %vm806_vm1, %v347_v40, 0.0  ;;  %v352_v46 = vsel %vm810_vm2, %v348_v43, 0.0 }
  0x4a   : > { %v353_v48 = vsel %vm291_vm0, %v351_v44, 0.0  ;;  %v360_v49 = vsel %vm291_vm0, %v352_v46, 0.0  ;;  %v325_v50 = vrot.slane %v324_v45, 1  ;;  %v332_v51 = vrot.slane %v331_v47, 1 }
  0x4b   : > { %v354_v52 = vrot.slane %v353_v48, 4  ;;  %v361_v53 = vrot.slane %v360_v49, 4 }
  0x4c   : > { %v326_v54 = vadd.f32 %v325_v50, %v324_v45  ;;  %v333_v55 = vadd.f32 %v332_v51, %v331_v47 }
  0x4d   : > { %v355_v56 = vadd.f32 %v354_v52, %v353_v48  ;;  %v362_v57 = vadd.f32 %v361_v53, %v360_v49 }
  0x4e   : > { %637 = vlog2.f32 %v326_v54 }
  0x4f   : > { %639 = vlog2.f32 %v333_v55  ;;  %v356_v58 = vrot.slane %v355_v56, 2  ;;  %v363_v59 = vrot.slane %v362_v57, 2 }
  0x51   : > { %v357_v60 = vadd.f32 %v356_v58, %v355_v56  ;;  %v364_v62 = vadd.f32 %v363_v59, %v362_v57 }
  0x53   : > { %v358_v4 = vrot.slane %v357_v60, 1  ;;  %v365_v8 = vrot.slane %v364_v62, 1 }
  0x54   : > { %v638_v61 = vpop.eup %637 }
  0x55   : > { %v640_v63 = vpop.eup %639  ;;  %v335_v3 = vmul.f32 0.6931472, %v638_v61  ;;  %v359_v14 = vadd.f32 %v358_v4, %v357_v60  ;;  %v366_v16 = vadd.f32 %v365_v8, %v364_v62 }
  0x56   : > { %v337_v7 = vmul.f32 0.6931472, %v640_v63 }
  0x57   : > { %v338_v13 = vadd.f32 %v335_v3, %v798_v19 }
  0x58   : > { %v339_v15 = vadd.f32 %v337_v7, %v796_v18 }
  0x59   : > { %v388_v25 = vsub.f32 %v338_v13, %v359_v14 }
  0x5a   : > { %v389_v26 = vsub.f32 %v339_v15, %v366_v16 }
  0x88   : > { %v370_v0 = vpop.permute.xlu0 %369 }
  0x89   : > { %v372_v1 = vsel %vm806_vm1, %v370_v0, 0.0  ;;  %v373_v2 = vsel %vm810_vm2, %v370_v0, 0.0 }
  0x8a   : > { %v374_v5 = vsel %vm291_vm0, %v372_v1, 0.0  ;;  %v381_v6 = vsel %vm291_vm0, %v373_v2, 0.0 }
  0x8b   : > { %v375_v9 = vrot.slane %v374_v5, 4  ;;  %v382_v10 = vrot.slane %v381_v6, 4 }
  0x8d   : > { %v376_v11 = vadd.f32 %v375_v9, %v374_v5  ;;  %v383_v12 = vadd.f32 %v382_v10, %v381_v6 }
  0x8f   : > { %v377_v17 = vrot.slane %v376_v11, 2  ;;  %v384_v20 = vrot.slane %v383_v12, 2 }
  0x91   : > { %v378_v21 = vadd.f32 %v377_v17, %v376_v11  ;;  %v385_v22 = vadd.f32 %v384_v20, %v383_v12 }
  0x93   : > { %v379_v23 = vrot.slane %v378_v21, 1  ;;  %v386_v24 = vrot.slane %v385_v22, 1 }
  0x95   : > { %v380_v27 = vadd.f32 %v379_v23, %v378_v21  ;;  %v387_v28 = vadd.f32 %v386_v24, %v385_v22 }
  0x97   : > { %v390_v29 = vmul.f32 %v388_v25, %v380_v27  ;;  %v391_v30 = vmul.f32 %v389_v26, %v387_v28 }
  0x99   : > { %v394_v19 = vsel %vm392_vm3, %v391_v30, %v387_v28  ;;  %v393_v18 = vsel %vm392_vm3, %v390_v29, %v380_v27 }
  0x9a   : > { %v403_v32 = vrot.slane %v394_v19, 6 }
  0x9b   : > { %441 = sbr.rel (!%p437_p6) target bundleno = 297 (0x129), region = 48 }
  0x9c   : > { %v405_v33 = vsel %vm404_vm4, %v393_v18, %v403_v32 }
  0x9d   : > { %v407_v34 = vadd.f32 %v405_v33, %v400_v31 }
  0x9f   : > { %408 = vst [vmem:[#allocation2] sm:$0xf] %v407_v34 }
  0xa6   : > { %v442_v35 = vld [vmem:[#allocation2] sm:$0xf] }
  0xa7   : > { %v444_v36 = vperm.slane %v442_v35, 0  ;;  %v445_v37 = vperm.slane %v442_v35, 2  ;;  %v455_v40 = vperm.slane %v442_v35, 1  ;;  %v456_v41 = vperm.slane %v442_v35, 3 }
  0xa9   : > { %v448_v38 = vsel %vm392_vm3, %v444_v36, 0.0  ;;  %v449_v39 = vsel %vm392_vm3, %v445_v37, 0.0  ;;  %v460_v43 = vsel %vm459_vm5, %v455_v40, 0.0  ;;  %v461_v44 = vsel %vm459_vm5, %v456_v41, 0.0 }
  0xaa   : > { %v450_v42 = vadd.f32 %v449_v39, %v448_v38  ;;  %v462_v45 = vadd.f32 %v461_v44, %v460_v43 }
  0xac   : > { %451 = vadd.xlane.f32.xlu0 %v450_v42 }
  0xb4   : > { %463 = vadd.xlane.f32.xlu0 %v462_v45 }
 0x11f   : > { %v452_v46 = vpop.xlane.xlu0 %451 }
 0x120   : > { %454 = vst.msk [vmem:[#allocation3] sm:$0x1] %vm453_vm6, %v452_v46 }
 0x127   : > { %v464_v47 = vpop.xlane.xlu0 %463 }
 0x128   : > { %466 = vst.msk [vmem:[#allocation5 - $0x1] sm:$0x2] %vm465_vm7, %v464_v47 }
 0x129 PF: > { %p836_p7 = scmp.eq.s32.totalorder %s576_s18, 1  ;;  %s476_s8 = sshll.u32 %s870_s3, 4  ;;  %s477_s8 = int_to_ptr.hbm [resolvable:$true] %s476_s8 }
 0x12a   : > { %s731_s9 = smov [#allocation3]   ;;  %s732_s11 = smov [#allocation5]  }
 0x12b   : > { %s474_s10 = sshll.u32 %s731_s9, 4  ;;  %s487_s12 = sshll.u32 %s732_s11, 4  ;;  %s475_s10 = int_to_ptr.vmem [resolvable:$true] %s474_s10  ;;  %s488_s12 = int_to_ptr.vmem [resolvable:$true] %s487_s12 }
 0x12c   : > { %595 = dma.vmem_to_hbm [thread:$0]  (%p836_p7), %s475_s10, 16, %s477_s8, [#allocation4]  }
 0x12d   : > { %s489_s15 = sshll.u32 %s871_s4, 4  ;;  %s490_s15 = int_to_ptr.hbm [resolvable:$true] %s489_s15 }
 0x12e   : > { %597 = dma.vmem_to_hbm [thread:$0]  (%p836_p7), %s488_s12, 16, %s490_s15, [#allocation6]  }
 0x12f   : > { %710 = dma.done.wait (%p836_p7), [#allocation4], 16  }
 0x130   : > { %712 = vsyncadd (%p836_p7), [#allocation4], 4294967280 }
 0x131   : > { %714 = dma.done.wait (%p836_p7), [#allocation6], 16  }
 0x132   : > { %716 = vsyncadd (%p836_p7), [#allocation6], 4294967280 }
 0x133 PF: > { %s17_s17 = sadd.s32 1, %s727_s17   ;;  %s877_s15 = smov %s723_s16 }
 0x134   : > { %p14_p8 = scmp.ge.s32.totalorder %s17_s17, 4   ;;  %s878_s16 = smov %s880_s19 }
 0x136   :  { %16 = sbr.rel (!%p14_p8) target bundleno = 3 (0x3), region = 88 }
 0x13b   :  { %508 = vsyncpa [#allocation4], 1 }
 0x13c   :  { %510 = vsyncpa [#allocation4 + $0x1], 1 }
 0x13d   :  { %511 = vsyncpa [#allocation6], 1 }

</bundles_post_ra>
